<compile_context>
chip_gen: v7x
topology: tpu7x:2x2x1
jax: 0.10.0
libtpu: 0.0.40
codegen_flags: <defaults>
</compile_context>

<pallas_src>
import jax
import jax.numpy as jnp
from jax.experimental import pallas as pl
from jax.experimental.pallas import tpu as pltpu


def _pos_enc_kernel(col_ref, row_ref, out_ref):
    # col_ref: [F, 1, w]    col_embed(arange(w)).T  -> ready for sublane bcast
    # row_ref: [F, h_t, 1]  row_embed(tile rows).T  -> ready for lane bcast
    # out_ref: [2F, h_t, w] NCHW-native positional-map tile
    f = col_ref.shape[0]
    w = col_ref.shape[2]
    h_t = row_ref.shape[1]
    # x half: out[c, i, j] = col[j, c]   (broadcast across rows i -> sublanes)
    out_ref[:f, :, :] = jnp.broadcast_to(col_ref[...], (f, h_t, w)).astype(out_ref.dtype)
    # y half: out[F+c, i, j] = row[i, c] (broadcast across cols j -> lanes)
    out_ref[f:, :, :] = jnp.broadcast_to(row_ref[...], (f, h_t, w)).astype(out_ref.dtype)


def learned_positional_encoding(mask, col_weight, row_weight,
                                *, vmem_block_budget_bytes=8 * 1024 * 1024):
    """mask: [bs, h, w]; col_weight: [col_num_embed, F]; row_weight: [row_num_embed, F].

    Returns pos: [bs, 2F, h, w] (matches the PyTorch module's NCHW output).
    """
    bs, h, w = mask.shape
    f = col_weight.shape[-1]
    assert row_weight.shape[-1] == f, "row/col embeddings must share num_feats"
    assert col_weight.dtype == row_weight.dtype
    assert w <= col_weight.shape[0] and h <= row_weight.shape[0]
    dtype = col_weight.dtype
    two_f = 2 * f

    # Wrapper-side layout plumbing on the tiny tables (each <= [50, F]):
    #   col -> [F, 1, w]  (w on lanes),  row -> [F, h, 1]  (h on sublanes).
    colT = jnp.transpose(col_weight[:w])[:, None, :]
    rowT = jnp.transpose(row_weight[:h])[:, :, None]

    # h-tile sizing: one output block is [2F, h_tile, w]; keep the double-
    # buffered block well inside scoped VMEM (matters for production BEV
    # sizes, esp. v7x).  Small maps collapse to a single grid step.
    bytes_per_row = two_f * w * jnp.dtype(dtype).itemsize
    max_rows = max(1, vmem_block_budget_bytes // (2 * bytes_per_row))
    if max_rows >= h:
        h_tile = h
    else:
        h_tile = max(8, (max_rows // 8) * 8)   # keep sublane dim a multiple of 8
    n_tiles = pl.cdiv(h, h_tile)

    pos_chw = pl.pallas_call(
        _pos_enc_kernel,
        out_shape=jax.ShapeDtypeStruct((two_f, h, w), dtype),
        grid_spec=pltpu.PrefetchScalarGridSpec(
            num_scalar_prefetch=0,
            grid=(n_tiles,),
            in_specs=[
                # Full (tiny) col table every step; Pallas skips the re-DMA
                # because the block index is constant across steps.
                pl.BlockSpec((f, 1, w), lambda i: (0, 0, 0)),
                # Only the rows of this h-tile.
                pl.BlockSpec((f, h_tile, 1), lambda i: (0, i, 0)),
            ],
            out_specs=pl.BlockSpec((two_f, h_tile, w), lambda i: (0, i, 0)),
        ),
        compiler_params=pltpu.CompilerParams(
            dimension_semantics=("parallel",),   # h-tiles split across TCs (v7x)
        ),
    )(colT, rowT)

    # Batch-invariant map: broadcast lazily instead of writing bs HBM copies.
    return jnp.broadcast_to(pos_chw[None], (bs, two_f, h, w))


def _reference(mask, col_weight, row_weight):
    bs, h, w = mask.shape
    f = col_weight.shape[-1]
    x_embed = col_weight[:w]                               # [w, F]
    y_embed = row_weight[:h]                               # [h, F]
    x_part = jnp.broadcast_to(x_embed[None, :, :], (h, w, f))
    y_part = jnp.broadcast_to(y_embed[:, None, :], (h, w, f))
    pos = jnp.concatenate([x_part, y_part], axis=-1)       # [h, w, 2F]
    pos = jnp.transpose(pos, (2, 0, 1))[None]               # [1, 2F, h, w]
    return jnp.broadcast_to(pos, (bs, 2 * f, h, w))


if __name__ == "__main__":
    key = jax.random.PRNGKey(0)
    k_row, k_col, k_mask = jax.random.split(key, 3)

    row_num_embed = 50
    col_num_embed = 50
    num_feats = 16          # final channel dim = 2 * num_feats = 32

    # nn.Embedding default init: N(0, 1)
    row_weight = jax.random.normal(k_row, (row_num_embed, num_feats), jnp.float32)
    col_weight = jax.random.normal(k_col, (col_num_embed, num_feats), jnp.float32)

    ok = True
    for (bs, h, w) in [(2, 8, 8), (2, 8, 24)]:   # square + asymmetric h/w
        mask = (jax.random.uniform(k_mask, (bs, h, w)) > 0.5).astype(jnp.uint8)
        pos = learned_positional_encoding(mask, col_weight, row_weight)
        pos = jax.block_until_ready(pos)
        ref = _reference(mask, col_weight, row_weight)
        assert pos.shape == (bs, 2 * num_feats, h, w), pos.shape
        ok = ok and bool(jnp.allclose(pos, ref))

    assert ok, "mismatch vs reference"
    print("KERNEL_OK")
</pallas_src>

<mosaic_0001>
module attributes {stable_mosaic.version = 11 : i64} {
  func.func @_pos_enc_kernel(%arg0: i32, %arg1: memref<16x1x8xf32, #tpu.memory_space<vmem>>, %arg2: memref<16x8x1xf32, #tpu.memory_space<vmem>>, %arg3: memref<32x8x8xf32, #tpu.memory_space<vmem>>) attributes {dimension_semantics = [#tpu.dimension_semantics<parallel>], iteration_bounds = array<i64: 1>, scalar_prefetch = 0 : i64, scratch_operands = 0 : i64, tpu.core_type = #tpu.core_type<tc>, window_params = [{pipeline_mode = #tpu.pipeline_mode<synchronous>, transform_indices = @transform_0, window_bounds = array<i64: 16, 1, 8>}, {transform_indices = @transform_1, window_bounds = array<i64: 16, 8, 1>}, {transform_indices = @transform_2, window_bounds = array<i64: 32, 8, 8>}]} {
    %c0 = arith.constant 0 : index
    %c0_0 = arith.constant 0 : index
    %c0_1 = arith.constant 0 : index
    %0 = vector.load %arg1[%c0, %c0_0, %c0_1] : memref<16x1x8xf32, #tpu.memory_space<vmem>>, vector<16x1x8xf32>
    %1 = vector.shape_cast %0 : vector<16x1x8xf32> to vector<16x1x8xf32>
    %2 = vector.broadcast %1 : vector<16x1x8xf32> to vector<16x8x8xf32>
    %c0_2 = arith.constant 0 : index
    %c0_3 = arith.constant 0 : index
    %c0_4 = arith.constant 0 : index
    %3 = vector.load %arg3[%c0_2, %c0_3, %c0_4] : memref<32x8x8xf32, #tpu.memory_space<vmem>>, vector<16x8x8xf32>
    tpu.vector_store %arg3[%c0_2, %c0_3, %c0_4], %2 {strides = array<i32>} : memref<32x8x8xf32, #tpu.memory_space<vmem>>, vector<16x8x8xf32>,
    %c0_5 = arith.constant 0 : index
    %c0_6 = arith.constant 0 : index
    %c0_7 = arith.constant 0 : index
    %4 = vector.load %arg2[%c0_5, %c0_6, %c0_7] : memref<16x8x1xf32, #tpu.memory_space<vmem>>, vector<16x8x1xf32>
    %5 = vector.shape_cast %4 : vector<16x8x1xf32> to vector<16x8x1xf32>
    %6 = vector.broadcast %5 : vector<16x8x1xf32> to vector<16x8x8xf32>
    %c16 = arith.constant 16 : index
    %c0_8 = arith.constant 0 : index
    %c0_9 = arith.constant 0 : index
    %7 = vector.load %arg3[%c16, %c0_8, %c0_9] : memref<32x8x8xf32, #tpu.memory_space<vmem>>, vector<16x8x8xf32>
    tpu.vector_store %arg3[%c16, %c0_8, %c0_9], %6 {strides = array<i32>} : memref<32x8x8xf32, #tpu.memory_space<vmem>>, vector<16x8x8xf32>,
    return
  }
  func.func @transform_0(%arg0: i32) -> (i32, i32, i32) {
    %c0_i32 = arith.constant 0 : i32
    %c0_i32_0 = arith.constant 0 : i32
    %c0_i32_1 = arith.constant 0 : i32
    %c0_i32_2 = arith.constant 0 : i32
    return %c0_i32, %c0_i32_0, %c0_i32_1 : i32, i32, i32
  }
  func.func @transform_1(%arg0: i32) -> (i32, i32, i32) {
    %c0_i32 = arith.constant 0 : i32
    %c0_i32_0 = arith.constant 0 : i32
    %c0_i32_1 = arith.constant 0 : i32
    return %c0_i32, %arg0, %c0_i32_0 : i32, i32, i32
  }
  func.func @transform_2(%arg0: i32) -> (i32, i32, i32) {
    %c0_i32 = arith.constant 0 : i32
    %c0_i32_0 = arith.constant 0 : i32
    %c0_i32_1 = arith.constant 0 : i32
    return %c0_i32, %arg0, %c0_i32_0 : i32, i32, i32
  }
}

</mosaic_0001>

<bundles_post_ra>
// kernel: tpu_custom_call.1
= control target key start
LH: loop header
LB: loop body
LE: loop exit
PB: predicated region body
PF: predicated region fallthrough
CT: control target
= control target key end

     0   :  { %v292_v0 = vmov 0   ;;  %vm123_vm0 = vcmask 64512   ;;  %s532_s1 = inlined_call_operand.vmem [shape: f32[16,8,1], index: 1, kind: input, shape index: {}]   ;;  %s533_s0 = inlined_call_operand.vmem [shape: f32[16,1,8], index: 0, kind: input, shape index: {}]   ;;  %s534_s2 = inlined_call_operand.vmem [shape: f32[32,8,8], index: 2, kind: output, shape index: {}]  }
   0x1   :  { %291 = vset.pattern.permute.xlu1 %v292_v0  ;;  %290 = vset.pattern.permute.xlu0 %v292_v0  ;;  %v142_v1 = vld [vmem:[%s532_s1 + $0x10] sm:$0xff]  ;;  %v140_v2 = vld [vmem:[%s532_s1] sm:$0xff]  ;;  %v143_v3 = vld [vmem:[%s532_s1 + $0x18] sm:$0xff] }
   0x2   :  { %168 = vperm.xlu1 %291, %v142_v1   ;;  %158 = vperm.xlu0 %290, %v140_v2   ;;  %v141_v4 = vld [vmem:[%s532_s1 + $0x8] sm:$0xff]  ;;  %v144_v6 = vld [vmem:[%s532_s1 + $0x20] sm:$0xff]  ;;  %v147_v15 = vld [vmem:[%s532_s1 + $0x38] sm:$0xff] }
   0x3   :  { %v145_v5 = vld [vmem:[%s532_s1 + $0x28] sm:$0xff]  ;;  %v257_v7 = vld [vmem:[%s533_s0] ss:$0 sm:$0xff]  ;;  %v258_v8 = vld [vmem:[%s533_s0 + $0x1] ss:$0 sm:$0xff] }
   0x4   :  { %v259_v9 = vld [vmem:[%s533_s0 + $0x2] ss:$0 sm:$0xff]  ;;  %v260_v10 = vld [vmem:[%s533_s0 + $0x3] ss:$0 sm:$0xff]  ;;  %v261_v11 = vld [vmem:[%s533_s0 + $0x4] ss:$0 sm:$0xff] }
   0x5   :  { %124 = vst.msk [vmem:[%s534_s2] sm:$0xff] %vm123_vm0, %v257_v7  ;;  %125 = vst.msk [vmem:[%s534_s2 + $0x8] sm:$0xff] %vm123_vm0, %v258_v8  ;;  %v262_v12 = vld [vmem:[%s533_s0 + $0x5] ss:$0 sm:$0xff]  ;;  %v263_v13 = vld [vmem:[%s533_s0 + $0x6] ss:$0 sm:$0xff] }
   0x6   :  { %173 = vperm.xlu1 %291, %v143_v3   ;;  %163 = vperm.xlu0 %290, %v141_v4   ;;  %v264_v14 = vld [vmem:[%s533_s0 + $0x7] ss:$0 sm:$0xff]  ;;  %126 = vst.msk [vmem:[%s534_s2 + $0x10] sm:$0xff] %vm123_vm0, %v259_v9  ;;  %127 = vst.msk [vmem:[%s534_s2 + $0x18] sm:$0xff] %vm123_vm0, %v260_v10  ;;  %v265_v16 = vld [vmem:[%s533_s0 + $0x8] ss:$0 sm:$0xff] }
   0x7   :  { %128 = vst.msk [vmem:[%s534_s2 + $0x20] sm:$0xff] %vm123_vm0, %v261_v11  ;;  %v266_v17 = vld [vmem:[%s533_s0 + $0x9] ss:$0 sm:$0xff]  ;;  %v267_v18 = vld [vmem:[%s533_s0 + $0xa] ss:$0 sm:$0xff]  ;;  %129 = vst.msk [vmem:[%s534_s2 + $0x28] sm:$0xff] %vm123_vm0, %v262_v12 }
   0x8   :  { %130 = vst.msk [vmem:[%s534_s2 + $0x30] sm:$0xff] %vm123_vm0, %v263_v13  ;;  %131 = vst.msk [vmem:[%s534_s2 + $0x38] sm:$0xff] %vm123_vm0, %v264_v14  ;;  %v268_v19 = vld [vmem:[%s533_s0 + $0xb] ss:$0 sm:$0xff]  ;;  %v269_v20 = vld [vmem:[%s533_s0 + $0xc] ss:$0 sm:$0xff] }
   0x9   :  { %v270_v21 = vld [vmem:[%s533_s0 + $0xd] ss:$0 sm:$0xff]  ;;  %132 = vst.msk [vmem:[%s534_s2 + $0x40] sm:$0xff] %vm123_vm0, %v265_v16  ;;  %133 = vst.msk [vmem:[%s534_s2 + $0x48] sm:$0xff] %vm123_vm0, %v266_v17  ;;  %v146_v22 = vld [vmem:[%s532_s1 + $0x30] sm:$0xff] }
   0xa   :  { %183 = vperm.xlu1 %291, %v145_v5   ;;  %178 = vperm.xlu0 %290, %v144_v6   ;;  %134 = vst.msk [vmem:[%s534_s2 + $0x50] sm:$0xff] %vm123_vm0, %v267_v18  ;;  %v271_v23 = vld [vmem:[%s533_s0 + $0xe] ss:$0 sm:$0xff]  ;;  %v272_v24 = vld [vmem:[%s533_s0 + $0xf] ss:$0 sm:$0xff]  ;;  %135 = vst.msk [vmem:[%s534_s2 + $0x58] sm:$0xff] %vm123_vm0, %v268_v19 }
   0xb   :  { %136 = vst.msk [vmem:[%s534_s2 + $0x60] sm:$0xff] %vm123_vm0, %v269_v20  ;;  %137 = vst.msk [vmem:[%s534_s2 + $0x68] sm:$0xff] %vm123_vm0, %v270_v21  ;;  %v149_v25 = vld [vmem:[%s532_s1 + $0x48] sm:$0xff]  ;;  %v148_v26 = vld [vmem:[%s532_s1 + $0x40] sm:$0xff] }
   0xc   :  { %138 = vst.msk [vmem:[%s534_s2 + $0x70] sm:$0xff] %vm123_vm0, %v271_v23  ;;  %139 = vst.msk [vmem:[%s534_s2 + $0x78] sm:$0xff] %vm123_vm0, %v272_v24  ;;  %v151_v27 = vld [vmem:[%s532_s1 + $0x58] sm:$0xff]  ;;  %v150_v28 = vld [vmem:[%s532_s1 + $0x50] sm:$0xff] }
   0xd   :  { %v153_v29 = vld [vmem:[%s532_s1 + $0x68] sm:$0xff]  ;;  %v152_v30 = vld [vmem:[%s532_s1 + $0x60] sm:$0xff]  ;;  %v155_v31 = vld [vmem:[%s532_s1 + $0x78] sm:$0xff] }
   0xe   :  { %193 = vperm.xlu1 %291, %v147_v15   ;;  %188 = vperm.xlu0 %290, %v146_v22   ;;  %v154_v32 = vld [vmem:[%s532_s1 + $0x70] sm:$0xff] }
  0x12   :  { %203 = vperm.xlu1 %291, %v149_v25   ;;  %198 = vperm.xlu0 %290, %v148_v26  }
  0x16   :  { %213 = vperm.xlu1 %291, %v151_v27   ;;  %208 = vperm.xlu0 %290, %v150_v28  }
  0x1a   :  { %223 = vperm.xlu1 %291, %v153_v29   ;;  %218 = vperm.xlu0 %290, %v152_v30  }
  0x1e   :  { %233 = vperm.xlu1 %291, %v155_v31   ;;  %228 = vperm.xlu0 %290, %v154_v32  }
  0x81   :  { %v169_v33 = vpop.permute.xlu1 %168  ;;  %v159_v34 = vpop.permute.xlu0 %158 }
  0x82   :  { %275 = vst.msk [vmem:[%s534_s2 + $0x90] sm:$0xff] %vm123_vm0, %v169_v33  ;;  %273 = vst.msk [vmem:[%s534_s2 + $0x80] sm:$0xff] %vm123_vm0, %v159_v34 }
  0x85   :  { %v174_v35 = vpop.permute.xlu1 %173  ;;  %v164_v36 = vpop.permute.xlu0 %163 }
  0x86   :  { %276 = vst.msk [vmem:[%s534_s2 + $0x98] sm:$0xff] %vm123_vm0, %v174_v35  ;;  %274 = vst.msk [vmem:[%s534_s2 + $0x88] sm:$0xff] %vm123_vm0, %v164_v36 }
  0x89   :  { %v184_v37 = vpop.permute.xlu1 %183  ;;  %v179_v38 = vpop.permute.xlu0 %178 }
  0x8a   :  { %278 = vst.msk [vmem:[%s534_s2 + $0xa8] sm:$0xff] %vm123_vm0, %v184_v37  ;;  %277 = vst.msk [vmem:[%s534_s2 + $0xa0] sm:$0xff] %vm123_vm0, %v179_v38 }
  0x8d   :  { %v194_v39 = vpop.permute.xlu1 %193  ;;  %v189_v40 = vpop.permute.xlu0 %188 }
  0x8e   :  { %280 = vst.msk [vmem:[%s534_s2 + $0xb8] sm:$0xff] %vm123_vm0, %v194_v39  ;;  %279 = vst.msk [vmem:[%s534_s2 + $0xb0] sm:$0xff] %vm123_vm0, %v189_v40 }
  0x91   :  { %v204_v41 = vpop.permute.xlu1 %203  ;;  %v199_v42 = vpop.permute.xlu0 %198 }
  0x92   :  { %282 = vst.msk [vmem:[%s534_s2 + $0xc8] sm:$0xff] %vm123_vm0, %v204_v41  ;;  %281 = vst.msk [vmem:[%s534_s2 + $0xc0] sm:$0xff] %vm123_vm0, %v199_v42 }
  0x95   :  { %v214_v43 = vpop.permute.xlu1 %213  ;;  %v209_v44 = vpop.permute.xlu0 %208 }
  0x96   :  { %284 = vst.msk [vmem:[%s534_s2 + $0xd8] sm:$0xff] %vm123_vm0, %v214_v43  ;;  %283 = vst.msk [vmem:[%s534_s2 + $0xd0] sm:$0xff] %vm123_vm0, %v209_v44 }
  0x99   :  { %v224_v45 = vpop.permute.xlu1 %223  ;;  %v219_v46 = vpop.permute.xlu0 %218 }
  0x9a   :  { %286 = vst.msk [vmem:[%s534_s2 + $0xe8] sm:$0xff] %vm123_vm0, %v224_v45  ;;  %285 = vst.msk [vmem:[%s534_s2 + $0xe0] sm:$0xff] %vm123_vm0, %v219_v46 }
  0x9d   :  { %v234_v47 = vpop.permute.xlu1 %233  ;;  %v229_v48 = vpop.permute.xlu0 %228 }
  0x9e   :  { %288 = vst.msk [vmem:[%s534_s2 + $0xf8] sm:$0xff] %vm123_vm0, %v234_v47  ;;  %287 = vst.msk [vmem:[%s534_s2 + $0xf0] sm:$0xff] %vm123_vm0, %v229_v48 }

</bundles_post_ra>
